<compile_context>
chip_gen: v7x
topology: tpu7x:2x2x1
jax: 0.10.0
libtpu: 0.0.40
codegen_flags: <defaults>
</compile_context>

<pallas_src>
import jax
import jax.numpy as jnp
from jax.experimental import pallas as pl
from jax.experimental.pallas import tpu as pltpu


_CT_CAP = 1024   # cap for the C tile (output minor dim -> lane-dense stores)
_WT_CAP = 512    # cap for the W tile


def _round_up(x: int, m: int) -> int:
    return ((x + m - 1) // m) * m


def _pick_tile(dim: int, cap: int) -> int:
    """Tile size for one axis.

    Full dim if it fits under the cap (always a legal block). Otherwise pick a
    128-multiple <= cap that (a) minimizes the number of blocks and (b) among
    those, minimizes the wasted (masked) tail. Ragged tails are handled by
    Pallas (padded reads / masked writes).
    """
    if dim <= cap:
        return dim
    capm = max(128, (cap // 128) * 128)
    n_blocks = -(-dim // capm)                     # fewest blocks at this cap
    return _round_up(-(-dim // n_blocks), 128)     # least tail waste at that count


def _im2seq_kernel(x_ref, o_ref):
    # x_ref: (ct, wt)  (B squeezed out by the BlockSpec)
    # o_ref: (wt, ct)
    o_ref[...] = x_ref[...].T
    # TODO(synk): for bf16/int8 inputs a u32 bitcast-pack transpose would halve
    # the XLU work; only worth it if a bundle dump shows the XLU slot bound.


def im2seq(x, *, ct_cap: int = _CT_CAP, wt_cap: int = _WT_CAP):
    """Im2Seq forward.

    Args:
      x: (B, C, H, W) array with H == 1 (PyTorch NCHW convention).
    Returns:
      (B, W, C) array — same values/dtype as x.squeeze(2).permute(0, 2, 1).
    """
    B, C, H, W = x.shape
    assert H == 1, "Im2Seq requires H == 1"

    # Drop the degenerate H axis at the JAX level: size-1 squeeze is a metadata
    # reshape and avoids any 8x sublane padding of an (H=1, W) minor pair.
    x3 = jnp.squeeze(x, axis=2)  # (B, C, W)

    ct = _pick_tile(C, ct_cap)
    wt = _pick_tile(W, wt_cap)
    n_ct = pl.cdiv(C, ct)
    n_wt = pl.cdiv(W, wt)

    # Grid ordering: W-tiles innermost for contiguous HBM streaming on 1-TC
    # chips; lead with a multi-block parallel axis so v7x's two TensorCores
    # both get work.
    if B >= 2:
        grid = (B, n_ct, n_wt)
        in_map = lambda b, ci, wi: (b, ci, wi)
        out_map = lambda b, ci, wi: (b, wi, ci)
    elif n_ct >= 2:
        grid = (n_ct, B, n_wt)
        in_map = lambda ci, b, wi: (b, ci, wi)
        out_map = lambda ci, b, wi: (b, wi, ci)
    else:
        grid = (n_wt, n_ct, B)
        in_map = lambda wi, ci, b: (b, ci, wi)
        out_map = lambda wi, ci, b: (b, wi, ci)

    itemsize = jnp.dtype(x.dtype).itemsize
    block_bytes = ct * wt * itemsize
    # 2 input + 2 output buffers (default double-buffering) + headroom,
    # clamped to the v7x-safe 32 MiB scoped budget.
    vmem_limit = int(min(32 * 2**20, max(16 * 2**20, 4 * block_bytes + 4 * 2**20)))

    return pl.pallas_call(
        _im2seq_kernel,
        out_shape=jax.ShapeDtypeStruct((B, W, C), x.dtype),
        grid=grid,
        in_specs=[pl.BlockSpec((None, ct, wt), in_map)],
        out_specs=pl.BlockSpec((None, wt, ct), out_map),
        compiler_params=pltpu.CompilerParams(
            dimension_semantics=("parallel", "parallel", "parallel"),
            vmem_limit_bytes=vmem_limit,
        ),
        cost_estimate=pl.CostEstimate(
            flops=0,
            transcendentals=0,
            bytes_accessed=2 * B * C * W * itemsize,
        ),
    )(x3)


if __name__ == "__main__":
    key = jax.random.PRNGKey(0)

    # Small shape consistent with the module (H must be 1).
    B, C, H, W = 2, 4, 1, 16
    x = jax.random.normal(key, (B, C, H, W), dtype=jnp.float32)
    out = jax.block_until_ready(im2seq(x))
    ref = jnp.transpose(jnp.squeeze(x, axis=2), (0, 2, 1))
    assert out.shape == (B, W, C), out.shape
    assert out.dtype == x.dtype
    assert jnp.allclose(out, ref), "mismatch vs reference (small case)"

    # Ragged-tile path: C % ct != 0 and W % wt != 0 (small caps keep it cheap).
    B2, C2, W2 = 1, 192, 320
    x2 = jax.random.normal(jax.random.PRNGKey(0), (B2, C2, 1, W2), dtype=jnp.float32)
    out2 = jax.block_until_ready(im2seq(x2, ct_cap=128, wt_cap=128))
    ref2 = jnp.transpose(jnp.squeeze(x2, axis=2), (0, 2, 1))
    assert out2.shape == (B2, W2, C2)
    assert jnp.allclose(out2, ref2), "mismatch vs reference (ragged case)"

    # Default-cap multi-block path (SVTR-like W=640 -> wt=384, 2 W-tiles).
    B3, C3, W3 = 2, 256, 640
    x3 = jax.random.normal(jax.random.PRNGKey(0), (B3, C3, 1, W3), dtype=jnp.float32)
    out3 = jax.block_until_ready(im2seq(x3))
    ref3 = jnp.transpose(jnp.squeeze(x3, axis=2), (0, 2, 1))
    assert out3.shape == (B3, W3, C3)
    assert jnp.allclose(out3, ref3), "mismatch vs reference (tiled case)"

    print("KERNEL_OK")
</pallas_src>

<mosaic_0001>
module attributes {stable_mosaic.version = 11 : i64} {
  func.func @_im2seq_kernel(%arg0: i32, %arg1: i32, %arg2: i32, %arg3: memref<1x4x16xf32, #tpu.memory_space<vmem>>, %arg4: memref<1x16x4xf32, #tpu.memory_space<vmem>>) attributes {dimension_semantics = [#tpu.dimension_semantics<parallel>, #tpu.dimension_semantics<parallel>, #tpu.dimension_semantics<parallel>], iteration_bounds = array<i64: 2, 1, 1>, scalar_prefetch = 0 : i64, scratch_operands = 0 : i64, tpu.core_type = #tpu.core_type<tc>, window_params = [{transform_indices = @transform_0, window_bounds = array<i64: 1, 4, 16>}, {transform_indices = @transform_1, window_bounds = array<i64: 1, 16, 4>}]} {
    %c0 = arith.constant 0 : index
    %c0_0 = arith.constant 0 : index
    %c0_1 = arith.constant 0 : index
    %0 = vector.load %arg3[%c0, %c0_0, %c0_1] : memref<1x4x16xf32, #tpu.memory_space<vmem>>, vector<1x4x16xf32>
    %1 = vector.shape_cast %0 : vector<1x4x16xf32> to vector<4x16xf32>
    %2 = tpu.transpose %1, [1, 0] : vector<4x16xf32> -> vector<16x4xf32>
    %c0_2 = arith.constant 0 : index
    %c0_3 = arith.constant 0 : index
    %c0_4 = arith.constant 0 : index
    %3 = vector.load %arg4[%c0_2, %c0_3, %c0_4] : memref<1x16x4xf32, #tpu.memory_space<vmem>>, vector<1x16x4xf32>
    %4 = vector.shape_cast %3 : vector<1x16x4xf32> to vector<16x4xf32>
    %5 = vector.shape_cast %2 : vector<16x4xf32> to vector<1x16x4xf32>
    tpu.vector_store %arg4[%c0_2, %c0_3, %c0_4], %5 {strides = array<i32>} : memref<1x16x4xf32, #tpu.memory_space<vmem>>, vector<1x16x4xf32>,
    return
  }
  func.func @transform_0(%arg0: i32, %arg1: i32, %arg2: i32) -> (i32, i32, i32) {
    %c0_i32 = arith.constant 0 : i32
    return %arg0, %arg1, %arg2 : i32, i32, i32
  }
  func.func @transform_1(%arg0: i32, %arg1: i32, %arg2: i32) -> (i32, i32, i32) {
    %c0_i32 = arith.constant 0 : i32
    return %arg0, %arg2, %arg1 : i32, i32, i32
  }
}

</mosaic_0001>

<bundles_post_ra>
// kernel: tpu_custom_call.1
= control target key start
LH: loop header
LB: loop body
LE: loop exit
PB: predicated region body
PF: predicated region fallthrough
CT: control target
= control target key end

     0   :  { %6 = vsyncpa [#allocation3], 0  ;;  %s608_s0 = inlined_call_operand.hbm [shape: f32[2,4,16], index: 0, kind: input, shape index: {}]   ;;  %s609_s1 = inlined_call_operand.vmem [shape: f32[2,16,4], index: 1, kind: output, shape index: {}]  }
   0x1   :  { %8 = vsyncpa [#allocation3 + $0x1], 0  ;;  %s483_s6 = smov 0   ;;  %s485_s7 = smov 0  }
   0x2   :  { %s487_s8 = smov 0   ;;  %s489_s9 = smov 0  }
   0x3   :  { %s491_s10 = smov 0   ;;  %s493_s11 = smov 0  }
   0x4 LB: > { %s321_s12 = sadd.s32 4294967295, %s470_s11   ;;  %s33_s13 = sadd.s32 1, %s466_s10  ;;  %s470_s11 = sphi %s493_s11, %s14_s11   ;;  %s466_s10 = sphi %s491_s10, %s619_s10   ;;  %s462_s9 = sphi %s489_s9, %s618_s9   ;;  %s458_s8 = sphi %s487_s8, %s617_s8   ;;  %s454_s7 = sphi %s485_s7, %s616_s7   ;;  %s450_s6 = sphi %s483_s6, %s615_s6  }
   0x5   : > { %p35_p0 = scmp.ge.s32.totalorder %s33_s13, 2  ;;  %s44_s14 = sadd.s32 1, %s458_s8 }
   0x6   : > { %p51_p1 = scmp.ne.s32.totalorder %s458_s8, %s454_s7  ;;  %p52_p2 = scmp.eq.s32.totalorder %s470_s11, 0 }
   0x7   : > { %s621_s13 = smov (%p35_p0, %s33_s13), 0  ;;  %p57_p4 = scmp.ne.s32.totalorder %s454_s7, %s450_s6 }
   0x8   : > { %p519_p3 = por %p52_p2, %p51_p1  ;;  %s37_s16 = ssub.s32 %s466_s10, %s621_s13 }
   0x9   : > { %p58_p5 = scmp.eq.s32.totalorder %s321_s12, 0  ;;  %p42_p6 = scmp.eq.s32.totalorder %s37_s16, 0 }
   0xa   : > { %p340_p8 = scmp.lt.s32.totalorder %s470_s11, 2  ;;  %s111_s19 = sand.u32 1, %s458_s8  }
   0xb   : > { %p526_p7 = por %p58_p5, %p57_p4  ;;  %s326_s20 = sshll.u32 %s466_s10, 6 }
   0xc   : > { %s532_s18 = scalar_select %p42_p6, %s458_s8, %s44_s14  }
   0xd   : > { %s325_s21 = sshll.u32 %s111_s19, 2  ;;  %s539_s24 = scalar_lea.hbm %s608_s0, %s326_s20 }
   0xe   : > { %s115_s25 = scalar_lea.vmem [#allocation2], %s325_s21  ;;  %p543_p9 = pnand %p340_p8, %p519_p3 }
   0xf   : > { %s124_s26 = sshll.u32 %s115_s25, 4  ;;  %s112_s28 = scalar_lea.sflag [#allocation3], %s111_s19  ;;  %s547_s26 = int_to_ptr.vmem [resolvable:$true] %s124_s26 }
  0x10   : > { %s390_s29 = scalar_lea.hbm %s539_s24, 64  ;;  %p392_p13 = pneg %p543_p9 }
  0x11   : > { %p391_p12 = scmp.ne.s32.totalorder %s539_s24, %s390_s29  ;;  %s395_s3 = scalar_lea.hbm %s608_s0, 128 }
  0x12   : > { %p396_p2 = scmp.lt.u32.totalorder %s539_s24, %s608_s0  ;;  %p397_p3 = scmp.lt.u32.totalorder %s395_s3, %s390_s29 }
  0x13   : > { %p393_p0 = pnand %p392_p13, %p391_p12  ;;  %p399_p5 = scmp.lt.u32.totalorder %s390_s29, %s539_s24 }
  0x14   : > { %p398_p4 = por %p397_p3, %p396_p2 }
  0x15   : > { %p394_p1 = pneg %p393_p0 }
  0x16   : > { %p400_p6 = por %p399_p5, %p398_p4 }
  0x18   : > { %p401_p8 = pnand %p400_p6, %p394_p1 }
  0x1a   : > { %404 = shalt.err (!%p401_p8)
}
  0x1b   : > { %s405_s6 = scalar_lea.vmem %s547_s26, 64  ;;  %s472_s12 = smov [#allocation2]  }
  0x1c   : > { %p406_p12 = scmp.ne.s32.totalorder %s547_s26, %s405_s6  ;;  %s410_s14 = sshll.u32 %s472_s12, 4  ;;  %s411_s14 = int_to_ptr.vmem [resolvable:$false] %s410_s14 }
  0x1d   : > { %s412_s15 = scalar_lea.vmem %s411_s14, 128  ;;  %p413_p11 = scmp.lt.s32.totalorder %s547_s26, %s411_s14 }
  0x1e   : > { %p408_p0 = pnand %p406_p12, %p392_p13  ;;  %p414_p2 = scmp.lt.s32.totalorder %s412_s15, %s405_s6 }
  0x20   : > { %p409_p10 = pneg %p408_p0  ;;  %p415_p3 = por %p414_p2, %p413_p11 }
  0x22   : > { %p416_p4 = pnand %p415_p3, %p409_p10 }
  0x24   : > { %419 = shalt.err (!%p416_p4)
}
  0x25   : > { %339 = dma.hbm_to_vmem [thread:$0]  (!%p543_p9), %s539_s24, 64, %s547_s26, %s112_s28  }
  0x26   : > { %p613_p1 = scmp.lt.s32.totalorder %s470_s11, 3  ;;  %p614_p5 = scmp.ge.s32.totalorder %s470_s11, 1 }
  0x28   : > { %p130_p13 = pnand %p614_p5, %p613_p1 }
  0x29   : > { %s135_s16 = sand.u32 (!%p130_p13), 1, %s454_s7  }
  0x2a   : > { %133 = sbr.rel (%p130_p13) target bundleno = 185 (0xb9), region = 24  ;;  %s328_s19 = sshll.u32 (!%p130_p13), %s135_s16, 2 }
  0x2b   : > { %s136_s20 = scalar_lea.sflag (!%p130_p13), [#allocation3], %s135_s16  ;;  %s139_s21 = scalar_lea.vmem (!%p130_p13), [#allocation2], %s328_s19 }
  0x31   : > { %445 = dma.done.wait (%p526_p7), %s136_s20, 64  }
  0x32   : > { %447 = vsyncadd (%p526_p7), %s136_s20, 4294967232  ;;  %v178_v0 = vld [vmem:[%s139_s21] sm:$0xf]  ;;  %p166_p9 = scmp.lt.s32.totalorder %s462_s9, 1  ;;  %vm211_vm0 = vcmask 31744  }
  0x33   : > { %179 = vxpose.xlu0.b32.start.end [1/1] (short) (narrow) %v178_v0, 16 }
  0x34   : > { %s623_s9 = smov (!%p166_p9, %s462_s9), 1 }
  0x35   : > { %s333_s22 = sshll.u32 %s623_s9, 4 }
  0x36   : > { %s176_s25 = scalar_lea.vmem %s609_s1, %s333_s22 }
  0xb3   : > { %v195_v1 = vpop.trf.xlu0 }
  0xb4   : > { %212 = vst.msk [vmem:[%s176_s25] sm:$0xff] %vm211_vm0, %v195_v1 }
  0xb7   : > { %v196_v2 = vpop.trf.xlu0 }
  0xb8   : > { %213 = vst.msk [vmem:[%s176_s25 + $0x8] sm:$0xff] %vm211_vm0, %v196_v2 }
  0xb9 PF: > { %s14_s11 = sadd.s32 1, %s470_s11   ;;  %s615_s6 = smov %s454_s7 }
  0xba   : > { %p11_p7 = scmp.ge.s32.totalorder %s14_s11, 4   ;;  %s616_s7 = smov %s458_s8 }
  0xbb   : > { %s617_s8 = smov %s532_s18  ;;  %s618_s9 = smov %s466_s10 }
  0xbc   : > { %s619_s10 = smov %s621_s13  ;;  %13 = sbr.rel (!%p11_p7) target bundleno = 4 (0x4), region = 64 }
  0xc3   :  { %250 = vsyncpa [#allocation3], 1 }
  0xc4   :  { %252 = vsyncpa [#allocation3 + $0x1], 1 }

</bundles_post_ra>
